<compile_context>
chip_gen: v7x
topology: tpu7x:2x2x1
jax: 0.10.0
libtpu: 0.0.40
codegen_flags: <defaults>
</compile_context>

<pallas_src>
import jax
import jax.numpy as jnp
from jax.experimental import pallas as pl
from jax.experimental.pallas import tpu as pltpu


# ----------------------------------------------------------------------------
# Kernel: one batch tile per grid step.  Shapes inside the kernel:
#   x_ref : (1, Bt)    batch on the lane axis
#   w1_ref: (25, 1)    fc1 weight column (torch W1 is (25, 1) already)
#   b1_ref: (25, 1)    fc1 bias column
#   w2_ref: (25, 1)    fc2 weight column (torch W2 is (1, 25), transposed)
#   b2_ref: (1, 1)     fc2 bias scalar, in SMEM
#   o_ref : (1, Bt)    lane-dense output tile
# ----------------------------------------------------------------------------
def _mlp_kernel(x_ref, w1_ref, b1_ref, w2_ref, b2_ref, o_ref):
    x = x_ref[...]                                           # (1, Bt)
    # fc1 + ReLU: pure VPU broadcast multiply-add (no MXU for a K=1 "matmul").
    h = jnp.maximum(w1_ref[...] * x + b1_ref[...], 0.0)      # (25, Bt)
    # fc2: VPU multiply + XLU sublane reduction (no MXU for an N=1 "matmul").
    o = jnp.sum(h * w2_ref[...], axis=0, keepdims=True)      # (1, Bt)
    o_ref[...] = (o + b2_ref[0, 0]).astype(o_ref.dtype)


def _net_forward_pallas(x, w1, b1, w2, b2, *, batch_tile=512):
    """x: (B, 1) f32. w1: (25, 1), b1: (25,), w2: (1, 25), b2: (1,) torch layout."""
    B = x.shape[0]
    Bt = batch_tile
    n_tiles = pl.cdiv(B, Bt)
    Bp = n_tiles * Bt

    # Layout plumbing stays in the wrapper (not inside the kernel):
    # batch -> lane axis, weights -> (25, 1) columns, b2 -> SMEM scalar.
    x_t = jnp.pad(x.reshape(1, B), ((0, 0), (0, Bp - B)))    # (1, Bp)
    w1_c = w1.reshape(25, 1).astype(jnp.float32)
    b1_c = b1.reshape(25, 1).astype(jnp.float32)
    w2_c = w2.reshape(25, 1).astype(jnp.float32)             # transpose of (1, 25)
    b2_s = b2.reshape(1, 1).astype(jnp.float32)

    const = lambda i: (0, 0)
    out_t = pl.pallas_call(
        _mlp_kernel,
        out_shape=jax.ShapeDtypeStruct((1, Bp), jnp.float32),
        grid=(n_tiles,),
        in_specs=[
            pl.BlockSpec((1, Bt), lambda i: (0, i)),               # x tile
            pl.BlockSpec((25, 1), const),                          # w1 (resident)
            pl.BlockSpec((25, 1), const),                          # b1 (resident)
            pl.BlockSpec((25, 1), const),                          # w2 (resident)
            pl.BlockSpec(memory_space=pltpu.MemorySpace.SMEM),     # b2 scalar
        ],
        out_specs=pl.BlockSpec((1, Bt), lambda i: (0, i)),
        compiler_params=pltpu.CompilerParams(
            dimension_semantics=("parallel",),                     # v7x: 2 TCs
        ),
    )(x_t, w1_c, b1_c, w2_c, b2_s)

    return out_t[0, :B].reshape(B, 1)


def _net_forward_jnp(x, w1, b1, w2, b2):
    """Plain-JAX fast path for tiny batches (launch/DMA overhead would dominate)."""
    h = jnp.maximum(x @ w1.T + b1, 0.0)
    return h @ w2.T + b2


def net_forward(x, w1, b1, w2, b2, *, batch_tile=512, min_pallas_batch=256):
    if x.shape[0] < min_pallas_batch:
        return _net_forward_jnp(x, w1, b1, w2, b2)
    return _net_forward_pallas(x, w1, b1, w2, b2, batch_tile=batch_tile)


def init_params(key):
    """Deterministic init mimicking torch.nn.Linear default (+/- 1/sqrt(fan_in)).

    Stored in torch layout: W1 (25, 1), b1 (25,), W2 (1, 25), b2 (1,).
    """
    k1, k2, k3, k4 = jax.random.split(key, 4)
    bound1 = 1.0                      # 1/sqrt(1)
    w1 = jax.random.uniform(k1, (25, 1), jnp.float32, -bound1, bound1)
    b1 = jax.random.uniform(k2, (25,), jnp.float32, -bound1, bound1)
    bound2 = 1.0 / jnp.sqrt(25.0)
    w2 = jax.random.uniform(k3, (1, 25), jnp.float32, -bound2, bound2)
    b2 = jax.random.uniform(k4, (1,), jnp.float32, -bound2, bound2)
    return w1, b1, w2, b2


if __name__ == "__main__":
    key = jax.random.PRNGKey(0)
    k_x, k_x2, k_p = jax.random.split(key, 3)
    w1, b1, w2, b2 = init_params(k_p)

    # --- Pallas path (batch large enough to amortize launch; 2 grid tiles) ---
    batch = 1024
    x = jax.random.normal(k_x, (batch, 1), jnp.float32)
    out = jax.block_until_ready(net_forward(x, w1, b1, w2, b2))
    ref = _net_forward_jnp(x, w1, b1, w2, b2)
    assert out.shape == (batch, 1)
    assert jnp.allclose(out, ref, atol=1e-5, rtol=1e-5)

    # --- Tiny-batch fast path (plain jnp dispatch) ---
    x_small = jax.random.normal(k_x2, (8, 1), jnp.float32)
    out_small = jax.block_until_ready(net_forward(x_small, w1, b1, w2, b2))
    ref_small = _net_forward_jnp(x_small, w1, b1, w2, b2)
    assert out_small.shape == (8, 1)
    assert jnp.allclose(out_small, ref_small, atol=1e-5, rtol=1e-5)

    print("KERNEL_OK")
</pallas_src>

<mosaic_0001>
module attributes {stable_mosaic.version = 11 : i64} {
  func.func @_mlp_kernel(%arg0: i32, %arg1: memref<1x512xf32, #tpu.memory_space<vmem>>, %arg2: memref<25x1xf32, #tpu.memory_space<vmem>>, %arg3: memref<25x1xf32, #tpu.memory_space<vmem>>, %arg4: memref<25x1xf32, #tpu.memory_space<vmem>>, %arg5: memref<1x1xf32, #tpu.memory_space<smem>>, %arg6: memref<1x512xf32, #tpu.memory_space<vmem>>) attributes {dimension_semantics = [#tpu.dimension_semantics<parallel>], iteration_bounds = array<i64: 2>, scalar_prefetch = 0 : i64, scratch_operands = 0 : i64, tpu.core_type = #tpu.core_type<tc>, window_params = [{transform_indices = @transform_0, window_bounds = array<i64: 1, 512>}, {pipeline_mode = #tpu.pipeline_mode<synchronous>, transform_indices = @transform_1, window_bounds = array<i64: 25, 1>}, {pipeline_mode = #tpu.pipeline_mode<synchronous>, transform_indices = @transform_2, window_bounds = array<i64: 25, 1>}, {pipeline_mode = #tpu.pipeline_mode<synchronous>, transform_indices = @transform_3, window_bounds = array<i64: 25, 1>}, {transform_indices = @transform_4, window_bounds = array<i64: 1, 1>}, {transform_indices = @transform_5, window_bounds = array<i64: 1, 512>}]} {
    %c0 = arith.constant 0 : index
    %c0_0 = arith.constant 0 : index
    %0 = vector.load %arg1[%c0, %c0_0] : memref<1x512xf32, #tpu.memory_space<vmem>>, vector<1x512xf32>
    %c0_1 = arith.constant 0 : index
    %c0_2 = arith.constant 0 : index
    %1 = vector.load %arg2[%c0_1, %c0_2] : memref<25x1xf32, #tpu.memory_space<vmem>>, vector<25x1xf32>
    %2 = vector.broadcast %1 : vector<25x1xf32> to vector<25x512xf32>
    %3 = vector.broadcast %0 : vector<1x512xf32> to vector<25x512xf32>
    %4 = arith.mulf %2, %3 : vector<25x512xf32>
    %c0_3 = arith.constant 0 : index
    %c0_4 = arith.constant 0 : index
    %5 = vector.load %arg3[%c0_3, %c0_4] : memref<25x1xf32, #tpu.memory_space<vmem>>, vector<25x1xf32>
    %6 = vector.broadcast %5 : vector<25x1xf32> to vector<25x512xf32>
    %7 = arith.addf %4, %6 : vector<25x512xf32>
    %cst = arith.constant 0.000000e+00 : f32
    %8 = vector.broadcast %cst : f32 to vector<25x512xf32>
    %9 = arith.maximumf %7, %8 : vector<25x512xf32>
    %c0_5 = arith.constant 0 : index
    %c0_6 = arith.constant 0 : index
    %10 = vector.load %arg4[%c0_5, %c0_6] : memref<25x1xf32, #tpu.memory_space<vmem>>, vector<25x1xf32>
    %11 = vector.broadcast %10 : vector<25x1xf32> to vector<25x512xf32>
    %12 = arith.mulf %9, %11 : vector<25x512xf32>
    %cst_7 = arith.constant dense<0.000000e+00> : vector<512xf32>
    %13 = vector.multi_reduction <add>, %12, %cst_7 [0] : vector<25x512xf32> to vector<512xf32>
    %14 = vector.shape_cast %13 : vector<512xf32> to vector<1x512xf32>
    %c0_8 = arith.constant 0 : index
    %c0_9 = arith.constant 0 : index
    %15 = memref.load %arg5[%c0_8, %c0_9] : memref<1x1xf32, #tpu.memory_space<smem>>
    %16 = vector.broadcast %15 : f32 to vector<1x512xf32>
    %17 = arith.addf %14, %16 : vector<1x512xf32>
    %c0_10 = arith.constant 0 : index
    %c0_11 = arith.constant 0 : index
    %18 = vector.load %arg6[%c0_10, %c0_11] : memref<1x512xf32, #tpu.memory_space<vmem>>, vector<1x512xf32>
    tpu.vector_store %arg6[%c0_10, %c0_11], %17 {strides = array<i32>} : memref<1x512xf32, #tpu.memory_space<vmem>>, vector<1x512xf32>,
    return
  }
  func.func @transform_0(%arg0: i32) -> (i32, i32) {
    %c0_i32 = arith.constant 0 : i32
    %c0_i32_0 = arith.constant 0 : i32
    return %c0_i32, %arg0 : i32, i32
  }
  func.func @transform_1(%arg0: i32) -> (i32, i32) {
    %c0_i32 = arith.constant 0 : i32
    %c0_i32_0 = arith.constant 0 : i32
    %c0_i32_1 = arith.constant 0 : i32
    return %c0_i32, %c0_i32_0 : i32, i32
  }
  func.func @transform_2(%arg0: i32) -> (i32, i32) {
    %c0_i32 = arith.constant 0 : i32
    %c0_i32_0 = arith.constant 0 : i32
    %c0_i32_1 = arith.constant 0 : i32
    return %c0_i32, %c0_i32_0 : i32, i32
  }
  func.func @transform_3(%arg0: i32) -> (i32, i32) {
    %c0_i32 = arith.constant 0 : i32
    %c0_i32_0 = arith.constant 0 : i32
    %c0_i32_1 = arith.constant 0 : i32
    return %c0_i32, %c0_i32_0 : i32, i32
  }
  func.func @transform_4(%arg0: i32) -> (i32, i32) {
    %c0_i32 = arith.constant 0 : i32
    %c0_i32_0 = arith.constant 0 : i32
    %c0_i32_1 = arith.constant 0 : i32
    return %c0_i32, %c0_i32_0 : i32, i32
  }
  func.func @transform_5(%arg0: i32) -> (i32, i32) {
    %c0_i32 = arith.constant 0 : i32
    %c0_i32_0 = arith.constant 0 : i32
    return %c0_i32, %arg0 : i32, i32
  }
}

</mosaic_0001>

<bundles_post_ra>
// kernel: tpu_custom_call.1
= control target key start
LH: loop header
LB: loop body
LE: loop exit
PB: predicated region body
PF: predicated region fallthrough
CT: control target
= control target key end

     0   :  { %s837_s0 = inlined_call_operand.vmem [shape: f32[1,1024], index: 0, kind: input, shape index: {}]   ;;  %s838_s1 = inlined_call_operand.vmem [shape: f32[25,1], index: 1, kind: input, shape index: {}]   ;;  %s839_s2 = inlined_call_operand.vmem [shape: f32[25,1], index: 2, kind: input, shape index: {}]   ;;  %s840_s3 = inlined_call_operand.vmem [shape: f32[25,1], index: 3, kind: input, shape index: {}]   ;;  %s841_s4 = inlined_call_operand.<no memory space> [shape: f32[1,1], index: 4, kind: input, shape index: {}]   ;;  %s842_s5 = inlined_call_operand.hbm [shape: f32[1,1024], index: 5, kind: output, shape index: {}]  }
   0x1   :  { %10 = sst [smem:[#allocation2]] %s841_s4 }
   0x2   :  { %11 = vsyncpa [#allocation4], 0 }
   0x3   :  { %13 = vsyncpa [#allocation4 + $0x1], 0  ;;  %s689_s20 = smov 0   ;;  %s691_s21 = smov 0  }
   0x4   :  { %s693_s22 = smov 0   ;;  %s695_s23 = smov 0  }
   0x5 LB: > { %s710_s4 = sadd.s32 4294967295, %s651_s23   ;;  %s534_s24 = sadd.s32 4294967294, %s651_s23   ;;  %s651_s23 = sphi %s695_s23, %s848_s23   ;;  %s647_s22 = sphi %s693_s22, %s847_s22   ;;  %s643_s21 = sphi %s691_s21, %s846_s21   ;;  %s639_s20 = sphi %s689_s20, %s845_s20  }
   0x6   : > { %s714_s25 = sadd.s32 1, %s651_s23   ;;  %s136_s26 = sadd.s32 1, %s647_s22 }
   0x7   : > { %s133_s27 = ssub.s32 %s651_s23, %s714_s25  ;;  %p146_p0 = scmp.ne.s32.totalorder %s647_s22, %s643_s21 }
   0x8   : > { %p134_p1 = scmp.eq.s32.totalorder %s133_s27, 0  ;;  %p147_p2 = scmp.eq.s32.totalorder %s710_s4, 1 }
   0x9   : > { %p152_p3 = scmp.ne.s32.totalorder %s643_s21, %s639_s20  ;;  %p153_p4 = scmp.eq.s32.totalorder %s534_s24, 1 }
   0xa   : > { %s725_s28 = scalar_select %p134_p1, %s647_s22, %s136_s26  }
   0xb   : > { %p727_p5 = por %p147_p2, %p146_p0  ;;  %p731_p6 = por %p153_p4, %p152_p3 }
   0xc   : > { %p537_p7 = scmp.ge.s32.totalorder %s651_s23, 1  ;;  %p191_p8 = scmp.lt.s32.totalorder %s651_s23, 3 }
   0xe   : > { %p192_p9 = pnand %p537_p7, %p191_p8 }
   0xf   : > { %v227_v0 = vld [vmem:[%s838_s1 + $0x10] sm:$0xff] (!%p192_p9)  ;;  %v225_v1 = vld [vmem:[%s838_s1] sm:$0xff] (!%p192_p9)  ;;  %v653_v2 = vmov (!%p192_p9), 0   ;;  %v226_v4 = vld [vmem:[%s838_s1 + $0x8] sm:$0xff] (!%p192_p9)  ;;  %s539_s13 = sshll.u32 (!%p192_p9), %s710_s4, 2  ;;  %v250_v13 = vlaneseq (!%p192_p9)  ;;  %vm384_vm0 = vcmask (!%p192_p9), 1040384  }
  0x10   : > { %195 = sbr.rel (%p192_p9) target bundleno = 208 (0xd0), region = 40  ;;  %588 = vset.pattern.permute.xlu1 (!%p192_p9), %v653_v2  ;;  %587 = vset.pattern.permute.xlu0 (!%p192_p9), %v653_v2  ;;  %v286_v3 = vld [vmem:[%s839_s2] sm:$0xff] (!%p192_p9)  ;;  %v228_v5 = vld [vmem:[%s838_s1 + $0x18] sm:$0x1] (!%p192_p9)  ;;  %v287_v6 = vld [vmem:[%s839_s2 + $0x8] sm:$0xff] (!%p192_p9)  ;;  %p219_p10 = scmp.lt.s32.totalorder (!%p192_p9), %s539_s13, 7 }
  0x11   : > { %241 = vperm.xlu1 (!%p192_p9), %588, %v227_v0   ;;  %231 = vperm.xlu0 (!%p192_p9), %587, %v225_v1   ;;  %v289_v7 = vld [vmem:[%s839_s2 + $0x18] sm:$0x1] (!%p192_p9)  ;;  %v288_v8 = vld [vmem:[%s839_s2 + $0x10] sm:$0xff] (!%p192_p9)  ;;  %v343_v9 = vld [vmem:[%s840_s3 + $0x8] sm:$0xff] (!%p192_p9)  ;;  %v775_v14 = vshrl.u32 (!%p192_p9), %v250_v13, 7  ;;  %s423_s17 = sld [smem:[#allocation2]] (!%p192_p9) }
  0x12   : > { %v342_v10 = vld [vmem:[%s840_s3] sm:$0xff] (!%p192_p9)  ;;  %v345_v11 = vld [vmem:[%s840_s3 + $0x18] sm:$0x1] (!%p192_p9)  ;;  %v344_v12 = vld [vmem:[%s840_s3 + $0x10] sm:$0xff] (!%p192_p9)  ;;  %s215_s18 = sand.u32 (!%p192_p9), 1, %s643_s21   ;;  %s545_s24 = sshll.u32 (!%p192_p9), %s710_s4, 6 }
  0x13   : > { %v252_v15 = vsub.s32 (!%p192_p9), 0, %v775_v14  ;;  %v256_v16 = vsub.s32 (!%p192_p9), 1, %v775_v14  ;;  %v260_v17 = vsub.s32 (!%p192_p9), 2, %v775_v14  ;;  %v264_v18 = vsub.s32 (!%p192_p9), 3, %v775_v14  ;;  %s538_s19 = sshll.u32 (!%p192_p9), %s215_s18, 2  ;;  %s795_s8 = scalar_lea.hbm (!%p192_p9), %s842_s5, %s545_s24 }
  0x14   : > { %s217_s26 = scalar_lea.vmem (!%p192_p9), [#allocation3], %s538_s19  ;;  %vm460_vm1 = vcmp.lt.s32.totalorder (!%p192_p9), %v250_v13, 512  ;;  %s464_s9 = scalar_lea.sflag (!%p192_p9), [#allocation4], %s215_s18 }
  0x15   : > { %292 = vperm.xlu1 (!%p192_p9), %588, %v286_v3   ;;  %236 = vperm.xlu0 (!%p192_p9), %587, %v226_v4   ;;  %s478_s27 = sshll.u32 (!%p192_p9), %s217_s26, 4  ;;  %s655_s4 = smov (!%p192_p9), [#allocation3]   ;;  %s797_s27 = int_to_ptr.vmem [resolvable:$true] %s478_s27 }
  0x16   : > { %s589_s10 = scalar_lea.vmem (!%p192_p9), %s797_s27, 64  ;;  %s593_s11 = sshll.u32 (!%p192_p9), %s655_s4, 4  ;;  %s594_s11 = int_to_ptr.vmem [resolvable:$false] %s593_s11 }
  0x17   : > { %s850_s13 = smov (!%p219_p10, %s539_s13), 7  ;;  %p590_p11 = scmp.ne.s32.totalorder %s797_s27, %s589_s10 }
  0x18   : > { %s221_s16 = scalar_lea.vmem %s837_s0, %s850_s13  ;;  %s595_s12 = scalar_lea.vmem %s594_s11, 128 }
  0x19   : > { %246 = vperm.xlu1 %588, %v228_v5   ;;  %297 = vperm.xlu0 %587, %v287_v6   ;;  %v224_v19 = vld [vmem:[%s221_s16] sm:$0xf]  ;;  %p591_p12 = pnand %p590_p11, %p727_p5  ;;  %p596_p0 = scmp.lt.s32.totalorder %s797_s27, %s594_s11 }
  0x1a   : > { %v253_v22 = vrot.slane %v224_v19, %v252_v15  ;;  %v257_v23 = vrot.slane %v224_v19, %v256_v16  ;;  %v261_v24 = vrot.slane %v224_v19, %v260_v17  ;;  %v265_v25 = vrot.slane %v224_v19, %v264_v18  ;;  %p597_p1 = scmp.lt.s32.totalorder %s595_s12, %s589_s10 }
  0x1b   : > { %p592_p13 = pneg %p591_p12 }
  0x1c   : > { %p598_p2 = por %p597_p1, %p596_p0 }
  0x1d   : > { %307 = vperm.xlu1 %588, %v289_v7   ;;  %302 = vperm.xlu0 %587, %v288_v8  }
  0x1e   : > { %p599_p3 = pnand %p598_p2, %p592_p13 }
  0x21   : > { %353 = vperm.xlu1 %588, %v343_v9   ;;  %348 = vperm.xlu0 %587, %v342_v10  }
  0x25   : > { %363 = vperm.xlu1 %588, %v345_v11   ;;  %358 = vperm.xlu0 %587, %v344_v12  }
  0x90   : > { %v242_v20 = vpop.permute.xlu1 %241  ;;  %v232_v21 = vpop.permute.xlu0 %231 }
  0x91   : > { %v270_v28 = vmul.f32 %v253_v22, %v232_v21  ;;  %v271_v29 = vmul.f32 %v257_v23, %v232_v21  ;;  %v272_v30 = vmul.f32 %v261_v24, %v232_v21  ;;  %v273_v31 = vmul.f32 %v265_v25, %v232_v21 }
  0x92   : > { %v278_v42 = vmul.f32 %v253_v22, %v242_v20  ;;  %v279_v43 = vmul.f32 %v257_v23, %v242_v20  ;;  %v280_v44 = vmul.f32 %v261_v24, %v242_v20  ;;  %v281_v45 = vmul.f32 %v265_v25, %v242_v20 }
  0x94   : > { %v293_v26 = vpop.permute.xlu1 %292  ;;  %v237_v27 = vpop.permute.xlu0 %236 }
  0x95   : > { %v310_v32 = vadd.f32 %v293_v26, %v270_v28  ;;  %v311_v33 = vadd.f32 %v293_v26, %v271_v29  ;;  %v312_v34 = vadd.f32 %v293_v26, %v272_v30  ;;  %v313_v35 = vadd.f32 %v293_v26, %v273_v31 }
  0x96   : > { %v274_v36 = vmul.f32 %v253_v22, %v237_v27  ;;  %v275_v37 = vmul.f32 %v257_v23, %v237_v27  ;;  %v276_v38 = vmul.f32 %v261_v24, %v237_v27  ;;  %v277_v39 = vmul.f32 %v265_v25, %v237_v27 }
  0x97   : > { %v326_v54 = vmax.f32 %v310_v32, 0.0  ;;  %v327_v55 = vmax.f32 %v311_v33, 0.0  ;;  %v328_v56 = vmax.f32 %v312_v34, 0.0  ;;  %v329_v57 = vmax.f32 %v313_v35, 0.0 }
  0x98   : > { %v247_v40 = vpop.permute.xlu1 %246  ;;  %v298_v41 = vpop.permute.xlu0 %297 }
  0x99   : > { %v314_v46 = vadd.f32 %v298_v41, %v274_v36  ;;  %v315_v47 = vadd.f32 %v298_v41, %v275_v37  ;;  %v316_v48 = vadd.f32 %v298_v41, %v276_v38  ;;  %v317_v49 = vadd.f32 %v298_v41, %v277_v39 }
  0x9a   : > { %v282_v50 = vmul.f32 %v253_v22, %v247_v40  ;;  %v283_v51 = vmul.f32 %v257_v23, %v247_v40  ;;  %v284_v52 = vmul.f32 %v261_v24, %v247_v40  ;;  %v285_v53 = vmul.f32 %v265_v25, %v247_v40 }
  0x9b   : > { %v330_v0 = vmax.f32 %v314_v46, 0.0  ;;  %v331_v1 = vmax.f32 %v315_v47, 0.0  ;;  %v332_v2 = vmax.f32 %v316_v48, 0.0  ;;  %v333_v3 = vmax.f32 %v317_v49, 0.0 }
  0x9c   : > { %v308_v58 = vpop.permute.xlu1 %307  ;;  %v303_v59 = vpop.permute.xlu0 %302 }
  0x9d   : > { %v322_v60 = vadd.f32 %v308_v58, %v282_v50  ;;  %v323_v61 = vadd.f32 %v308_v58, %v283_v51  ;;  %v324_v62 = vadd.f32 %v308_v58, %v284_v52  ;;  %v325_v63 = vadd.f32 %v308_v58, %v285_v53 }
  0x9e   : > { %v318_v4 = vadd.f32 %v303_v59, %v278_v42  ;;  %v319_v5 = vadd.f32 %v303_v59, %v279_v43  ;;  %v320_v6 = vadd.f32 %v303_v59, %v280_v44  ;;  %v321_v7 = vadd.f32 %v303_v59, %v281_v45 }
  0x9f   : > { %v338_v10 = vmax.f32 %v322_v60, 0.0  ;;  %v339_v11 = vmax.f32 %v323_v61, 0.0  ;;  %v340_v12 = vmax.f32 %v324_v62, 0.0  ;;  %v341_v15 = vmax.f32 %v325_v63, 0.0 }
  0xa0   : > { %v354_v8 = vpop.permute.xlu1 %353  ;;  %v349_v9 = vpop.permute.xlu0 %348  ;;  %v334_v24 = vmax.f32 %v318_v4, 0.0  ;;  %v335_v25 = vmax.f32 %v319_v5, 0.0  ;;  %v336_v26 = vmax.f32 %v320_v6, 0.0  ;;  %v337_v27 = vmax.f32 %v321_v7, 0.0 }
  0xa1   : > { %v370_v16 = vmul.f32 %v354_v8, %v330_v0  ;;  %v371_v17 = vmul.f32 %v354_v8, %v331_v1  ;;  %v372_v18 = vmul.f32 %v354_v8, %v332_v2  ;;  %v373_v19 = vmul.f32 %v354_v8, %v333_v3 }
  0xa2   : > { %v366_v20 = vmul.f32 %v349_v9, %v326_v54  ;;  %v367_v21 = vmul.f32 %v349_v9, %v327_v55  ;;  %v368_v22 = vmul.f32 %v349_v9, %v328_v56  ;;  %v369_v23 = vmul.f32 %v349_v9, %v329_v57 }
  0xa3   : > { %v654_v62 = vmov 1966171168  }
  0xa4   : > { %v364_v28 = vpop.permute.xlu1 %363  ;;  %v359_v29 = vpop.permute.xlu0 %358  ;;  %v382_v30 = vadd.f32 %v370_v16, %v366_v20  ;;  %v393_v31 = vadd.f32 %v371_v17, %v367_v21  ;;  %v403_v32 = vadd.f32 %v372_v18, %v368_v22  ;;  %v413_v33 = vadd.f32 %v373_v19, %v369_v23 }
  0xa5   : > { %v378_v34 = vmul.f32 %v364_v28, %v338_v10  ;;  %v379_v35 = vmul.f32 %v364_v28, %v339_v11  ;;  %v380_v36 = vmul.f32 %v364_v28, %v340_v12  ;;  %v381_v37 = vmul.f32 %v364_v28, %v341_v15 }
  0xa6   : > { %v374_v38 = vmul.f32 %v359_v29, %v334_v24  ;;  %v375_v39 = vmul.f32 %v359_v29, %v335_v25  ;;  %v376_v40 = vmul.f32 %v359_v29, %v336_v26  ;;  %v377_v41 = vmul.f32 %v359_v29, %v337_v27 }
  0xa7   : > { %v385_v42 = vsel %vm384_vm0, %v378_v34, 0.0  ;;  %v395_v43 = vsel %vm384_vm0, %v379_v35, 0.0  ;;  %v405_v44 = vsel %vm384_vm0, %v380_v36, 0.0  ;;  %v415_v45 = vsel %vm384_vm0, %v381_v37, 0.0 }
  0xa8   : > { %v383_v46 = vadd.f32 %v382_v30, %v374_v38  ;;  %v394_v47 = vadd.f32 %v393_v31, %v375_v39  ;;  %v404_v48 = vadd.f32 %v403_v32, %v376_v40  ;;  %v414_v49 = vadd.f32 %v413_v33, %v377_v41 }
  0xa9   : > { %v436_v63 = vunpack.c.l.s4 %v654_v62  ;;  %v424_v15 = vstv %s423_s17 }
  0xaa   : > { %v386_v50 = vadd.f32 %v385_v42, %v383_v46  ;;  %v396_v51 = vadd.f32 %v395_v43, %v394_v47  ;;  %v406_v52 = vadd.f32 %v405_v44, %v404_v48  ;;  %v416_v53 = vadd.f32 %v415_v45, %v414_v49 }
  0xab   : > { %v437_v8 = vunpack.c.0.s8 %v436_v63 }
  0xac   : > { %v387_v54 = vrot.slane %v386_v50, 4  ;;  %v397_v55 = vrot.slane %v396_v51, 4  ;;  %v407_v56 = vrot.slane %v406_v52, 4  ;;  %v417_v57 = vrot.slane %v416_v53, 4 }
  0xad   : > { %v440_v20 = vsub.s32 %v437_v8, %v775_v14 }
  0xae   : > { %v388_v58 = vadd.f32 %v387_v54, %v386_v50  ;;  %v398_v59 = vadd.f32 %v397_v55, %v396_v51  ;;  %v408_v60 = vadd.f32 %v407_v56, %v406_v52  ;;  %v418_v61 = vadd.f32 %v417_v57, %v416_v53 }
  0xb0   : > { %v389_v0 = vrot.slane %v388_v58, 2  ;;  %v399_v1 = vrot.slane %v398_v59, 2  ;;  %v409_v2 = vrot.slane %v408_v60, 2  ;;  %v419_v3 = vrot.slane %v418_v61, 2 }
  0xb2   : > { %v390_v4 = vadd.f32 %v389_v0, %v388_v58  ;;  %v400_v5 = vadd.f32 %v399_v1, %v398_v59  ;;  %v410_v6 = vadd.f32 %v409_v2, %v408_v60  ;;  %v420_v7 = vadd.f32 %v419_v3, %v418_v61 }
  0xb4   : > { %v391_v9 = vrot.slane %v390_v4, 1  ;;  %v401_v10 = vrot.slane %v400_v5, 1  ;;  %v411_v11 = vrot.slane %v410_v6, 1  ;;  %v421_v12 = vrot.slane %v420_v7, 1 }
  0xb6   : > { %v392_v16 = vadd.f32 %v391_v9, %v390_v4  ;;  %v402_v17 = vadd.f32 %v401_v10, %v400_v5  ;;  %v412_v18 = vadd.f32 %v411_v11, %v410_v6  ;;  %v422_v19 = vadd.f32 %v421_v12, %v420_v7 }
  0xb8   : > { %v425_v21 = vadd.f32 %v424_v15, %v392_v16  ;;  %v426_v22 = vadd.f32 %v424_v15, %v402_v17  ;;  %v427_v23 = vadd.f32 %v424_v15, %v412_v18  ;;  %v428_v24 = vadd.f32 %v424_v15, %v422_v19 }
  0xba   : > { %v433_v25 = vcombine.low %v425_v21, %v426_v22  ;;  %v434_v26 = vcombine.low %v427_v23, %v428_v24 }
  0xbc   : > { %v441_v27 = vrot.slane %v433_v25, %v440_v20  ;;  %v448_v28 = vrot.slane %v434_v26, %v440_v20 }
  0xbe   : > { %v449_v29 = vcombine.low %v441_v27, %v448_v28 }
  0xc0   : > { %v456_v30 = vrot.slane %v449_v29, %v440_v20 }
  0xc2   : > { %462 = vst.msk [vmem:[%s217_s26] sm:$0xf] %vm460_vm1, %v456_v30 }
  0xc3   : > { %602 = shalt.err (!%p599_p3)
}
  0xc4   : > { %s603_s13 = scalar_lea.hbm %s795_s8, 64  ;;  %s607_s16 = scalar_lea.hbm %s842_s5, 128 }
  0xc5   : > { %p604_p4 = scmp.ne.s32.totalorder %s795_s8, %s603_s13  ;;  %p608_p9 = scmp.lt.u32.totalorder %s795_s8, %s842_s5 }
  0xc6   : > { %p609_p10 = scmp.lt.u32.totalorder %s607_s16, %s603_s13  ;;  %p611_p12 = scmp.lt.u32.totalorder %s603_s13, %s795_s8 }
  0xc7   : > { %p605_p7 = pnand %p604_p4, %p727_p5 }
  0xc8   : > { %p610_p11 = por %p609_p10, %p608_p9 }
  0xc9   : > { %p606_p8 = pneg %p605_p7 }
  0xca   : > { %p612_p13 = por %p611_p12, %p610_p11 }
  0xcc   : > { %p613_p0 = pnand %p612_p13, %p606_p8 }
  0xce   : > { %616 = shalt.err (!%p613_p0)
}
  0xcf   : > { %546 = dma.vmem_to_hbm [thread:$0]  (%p727_p5), %s797_s27, 64, %s795_s8, %s464_s9  }
  0xd0 PF: > { %p552_p1 = scmp.ge.s32.totalorder %s651_s23, 2  ;;  %s490_s19 = sand.u32 1, %s639_s20  }
  0xd1   : > { %s491_s24 = scalar_lea.sflag [#allocation4], %s490_s19 }
  0xd2   : > { %p549_p2 = pnand %p552_p1, %p731_p6 }
  0xd4   : > { %634 = dma.done.wait (!%p549_p2), %s491_s24, 64  }
  0xd5   : > { %636 = vsyncadd (!%p549_p2), %s491_s24, 4294967232  ;;  %p16_p3 = scmp.ge.s32.totalorder %s714_s25, 4   ;;  %s845_s20 = smov %s643_s21 }
  0xd6   : > { %s846_s21 = smov %s647_s22  ;;  %s847_s22 = smov %s725_s28 }
  0xd7   : > { %s848_s23 = smov %s714_s25  ;;  %18 = sbr.rel (!%p16_p3) target bundleno = 5 (0x5), region = 75 }
  0xde   :  { %496 = vsyncpa [#allocation4], 1 }
  0xdf   :  { %498 = vsyncpa [#allocation4 + $0x1], 1 }

</bundles_post_ra>
